<compile_context>
chip_gen: v7x
topology: tpu7x:2x2x1
jax: 0.10.0
libtpu: 0.0.40
codegen_flags: <defaults>
</compile_context>

<pallas_src>
import functools

import jax
import jax.numpy as jnp
import numpy as np
from jax.experimental import pallas as pl
from jax.experimental.pallas import tpu as pltpu


def _relu(v):
    return jnp.maximum(v, 0.0)


def routed_ae_kernel(
    x_ref,
    rw1, rb1, rw2, rb2, rw3, rb3,          # router (shared)
    pw1, pb1, pw2, pb2, pw3, pb3,          # packed encoder layers (all experts)
    pw4, pb4, pw5, pb5, pw6, pb6,          # packed decoder layers (all experts)
    xhat_ref, logits_ref, eo_ref,          # outputs
    *, num_experts, input_dim,
):
    x = x_ref[...]

    # ---- router + softmax (computed once) ----
    h = _relu(jnp.dot(x, rw1[...], preferred_element_type=jnp.float32) + rb1[...])
    h = _relu(jnp.dot(h, rw2[...], preferred_element_type=jnp.float32) + rb2[...])
    logits = jnp.dot(h, rw3[...], preferred_element_type=jnp.float32) + rb3[...]
    logits_ref[...] = logits
    m = jnp.max(logits, axis=-1, keepdims=True)
    ex = jnp.exp(logits - m)
    probs = ex / jnp.sum(ex, axis=-1, keepdims=True)                  # (B, E)

    # ---- all experts fused: lane-packed first layer, block-diagonal rest ----
    h = _relu(jnp.dot(x, pw1[...], preferred_element_type=jnp.float32) + pb1[...])    # (B, E*H)
    h = _relu(jnp.dot(h, pw2[...], preferred_element_type=jnp.float32) + pb2[...])    # (B, E*H)
    z = jnp.tanh(jnp.dot(h, pw3[...], preferred_element_type=jnp.float32) + pb3[...]) # (B, E*L)
    h = _relu(jnp.dot(z, pw4[...], preferred_element_type=jnp.float32) + pb4[...])    # (B, E*H)
    h = _relu(jnp.dot(h, pw5[...], preferred_element_type=jnp.float32) + pb5[...])    # (B, E*H)
    eo = jnp.dot(h, pw6[...], preferred_element_type=jnp.float32) + pb6[...]          # (B, E*D)

    eo_ref[...] = eo                                                  # lane-dense store

    # ---- x_hat = sum_e probs[:, e] * expert_e output (static column slices) ----
    D = input_dim
    xhat = probs[:, 0:1] * eo[:, 0:D]
    for e in range(1, num_experts):
        xhat = xhat + probs[:, e:e + 1] * eo[:, e * D:(e + 1) * D]
    xhat_ref[...] = xhat


# ---------- weight packing helpers (run once, outside the kernel) ----------

def _pack_lanes(w):
    """(E, a, b) -> (a, E*b); expert e occupies lanes [e*b, (e+1)*b)."""
    E, a, b = w.shape
    return jnp.transpose(w, (1, 0, 2)).reshape(a, E * b)


def _pack_bias(b):
    """(E, 1, n) -> (1, E*n)."""
    E, _, n = b.shape
    return jnp.transpose(b, (1, 0, 2)).reshape(1, E * n)


def _block_diag(w):
    """(E, a, b) -> (E*a, E*b) block-diagonal (exact: off-diagonal zeros)."""
    E, a, b = w.shape
    out = jnp.zeros((E * a, E * b), w.dtype)
    for e in range(E):
        out = out.at[e * a:(e + 1) * a, e * b:(e + 1) * b].set(w[e])
    return out


def routed_autoencoder(x, p):
    B, D = x.shape
    E, _, H = p["ew1"].shape
    L = p["ew3"].shape[2]

    # Pack the expert axis into the lane dimension.
    pw1, pb1 = _pack_lanes(p["ew1"]), _pack_bias(p["eb1"])   # (D, E*H), (1, E*H)
    pw2, pb2 = _block_diag(p["ew2"]), _pack_bias(p["eb2"])   # (E*H, E*H)
    pw3, pb3 = _block_diag(p["ew3"]), _pack_bias(p["eb3"])   # (E*H, E*L)
    pw4, pb4 = _block_diag(p["dw1"]), _pack_bias(p["db1"])   # (E*L, E*H)
    pw5, pb5 = _block_diag(p["dw2"]), _pack_bias(p["db2"])   # (E*H, E*H)
    pw6, pb6 = _block_diag(p["dw3"]), _pack_bias(p["db3"])   # (E*H, E*D)

    kernel = functools.partial(routed_ae_kernel, num_experts=E, input_dim=D)

    vmem_spec = pl.BlockSpec(memory_space=pltpu.MemorySpace.VMEM)
    n_in = 19

    xhat, logits, eo_packed = pl.pallas_call(
        kernel,
        out_shape=[
            jax.ShapeDtypeStruct((B, D), jnp.float32),        # x_hat
            jax.ShapeDtypeStruct((B, E), jnp.float32),        # routing_logits
            jax.ShapeDtypeStruct((B, E * D), jnp.float32),    # expert_outputs (lane packed)
        ],
        in_specs=[vmem_spec] * n_in,
        out_specs=[vmem_spec] * 3,
    )(
        x,
        p["rw1"], p["rb1"], p["rw2"], p["rb2"], p["rw3"], p["rb3"],
        pw1, pb1, pw2, pb2, pw3, pb3,
        pw4, pb4, pw5, pb5, pw6, pb6,
    )

    expert_outputs = eo_packed.reshape(B, E, D)   # == torch.stack(expert_outputs, dim=1)
    return xhat, logits, expert_outputs


# ---------------------------- params & reference ----------------------------

def init_params(key, D, H, L, E):
    ks = jax.random.split(key, 18)

    def w(k, shape, fan_in):
        return (jax.random.normal(k, shape, jnp.float32) / jnp.sqrt(fan_in)
                ).astype(jnp.float32)

    p = {}
    # router: D -> H -> H -> E
    p["rw1"] = w(ks[0], (D, H), D); p["rb1"] = w(ks[1], (1, H), H)
    p["rw2"] = w(ks[2], (H, H), H); p["rb2"] = w(ks[3], (1, H), H)
    p["rw3"] = w(ks[4], (H, E), H); p["rb3"] = w(ks[5], (1, E), H)
    # per-expert encoder: D -> H -> H -> L
    p["ew1"] = w(ks[6], (E, D, H), D); p["eb1"] = w(ks[7], (E, 1, H), H)
    p["ew2"] = w(ks[8], (E, H, H), H); p["eb2"] = w(ks[9], (E, 1, H), H)
    p["ew3"] = w(ks[10], (E, H, L), H); p["eb3"] = w(ks[11], (E, 1, L), H)
    # per-expert decoder: L -> H -> H -> D
    p["dw1"] = w(ks[12], (E, L, H), L); p["db1"] = w(ks[13], (E, 1, H), H)
    p["dw2"] = w(ks[14], (E, H, H), H); p["db2"] = w(ks[15], (E, 1, H), H)
    p["dw3"] = w(ks[16], (E, H, D), H); p["db3"] = w(ks[17], (E, 1, D), H)
    return p


def ref_forward(x, p):
    """Pure-JAX reference matching the PyTorch forward semantics."""
    def fc(v, W, b, act):
        v = v @ W + b
        if act == "relu":
            return jnp.maximum(v, 0.0)
        if act == "tanh":
            return jnp.tanh(v)
        return v

    h = fc(x, p["rw1"], p["rb1"], "relu")
    h = fc(h, p["rw2"], p["rb2"], "relu")
    logits = fc(h, p["rw3"], p["rb3"], "linear")
    probs = jax.nn.softmax(logits, axis=-1)

    outs = []
    E = p["ew1"].shape[0]
    for e in range(E):
        h = fc(x, p["ew1"][e], p["eb1"][e], "relu")
        h = fc(h, p["ew2"][e], p["eb2"][e], "relu")
        z = fc(h, p["ew3"][e], p["eb3"][e], "tanh")
        h = fc(z, p["dw1"][e], p["db1"][e], "relu")
        h = fc(h, p["dw2"][e], p["db2"][e], "relu")
        y = fc(h, p["dw3"][e], p["db3"][e], "linear")
        outs.append(y)
    eo = jnp.stack(outs, axis=1)                      # (B, E, D)
    xhat = jnp.sum(eo * probs[:, :, None], axis=1)    # (B, D)
    return xhat, logits, eo


if __name__ == "__main__":
    # batch, input_dim, hidden_dim, latent_dim, num_experts
    # (B=8 fills the sublane dim; E*H = 128 fills the lane dim.)
    B, D, H, L, E = 8, 32, 32, 16, 4

    key = jax.random.PRNGKey(0)
    kx, kp = jax.random.split(key)
    x = jax.random.normal(kx, (B, D), jnp.float32)
    params = init_params(kp, D, H, L, E)

    xhat, logits, expert_outputs = routed_autoencoder(x, params)
    jax.block_until_ready((xhat, logits, expert_outputs))

    xhat_r, logits_r, eo_r = ref_forward(x, params)
    np.testing.assert_allclose(np.asarray(logits), np.asarray(logits_r), rtol=1e-5, atol=1e-5)
    np.testing.assert_allclose(np.asarray(expert_outputs), np.asarray(eo_r), rtol=1e-5, atol=1e-5)
    np.testing.assert_allclose(np.asarray(xhat), np.asarray(xhat_r), rtol=1e-5, atol=1e-5)

    print("KERNEL_OK")
</pallas_src>

<mosaic_0001>
module attributes {stable_mosaic.version = 11 : i64} {
  func.func @routed_ae_kernel(%arg0: memref<8x32xf32, #tpu.memory_space<vmem>>, %arg1: memref<32x32xf32, #tpu.memory_space<vmem>>, %arg2: memref<1x32xf32, #tpu.memory_space<vmem>>, %arg3: memref<32x32xf32, #tpu.memory_space<vmem>>, %arg4: memref<1x32xf32, #tpu.memory_space<vmem>>, %arg5: memref<32x4xf32, #tpu.memory_space<vmem>>, %arg6: memref<1x4xf32, #tpu.memory_space<vmem>>, %arg7: memref<32x128xf32, #tpu.memory_space<vmem>>, %arg8: memref<1x128xf32, #tpu.memory_space<vmem>>, %arg9: memref<128x128xf32, #tpu.memory_space<vmem>>, %arg10: memref<1x128xf32, #tpu.memory_space<vmem>>, %arg11: memref<128x64xf32, #tpu.memory_space<vmem>>, %arg12: memref<1x64xf32, #tpu.memory_space<vmem>>, %arg13: memref<64x128xf32, #tpu.memory_space<vmem>>, %arg14: memref<1x128xf32, #tpu.memory_space<vmem>>, %arg15: memref<128x128xf32, #tpu.memory_space<vmem>>, %arg16: memref<1x128xf32, #tpu.memory_space<vmem>>, %arg17: memref<128x128xf32, #tpu.memory_space<vmem>>, %arg18: memref<1x128xf32, #tpu.memory_space<vmem>>, %arg19: memref<8x32xf32, #tpu.memory_space<vmem>>, %arg20: memref<8x4xf32, #tpu.memory_space<vmem>>, %arg21: memref<8x128xf32, #tpu.memory_space<vmem>>) attributes {dimension_semantics = [], scalar_prefetch = 0 : i64, scratch_operands = 0 : i64, tpu.core_type = #tpu.core_type<tc>} {
    %c0 = arith.constant 0 : index
    %c0_0 = arith.constant 0 : index
    %0 = vector.load %arg0[%c0, %c0_0] : memref<8x32xf32, #tpu.memory_space<vmem>>, vector<8x32xf32>
    %c0_1 = arith.constant 0 : index
    %c0_2 = arith.constant 0 : index
    %1 = vector.load %arg1[%c0_1, %c0_2] : memref<32x32xf32, #tpu.memory_space<vmem>>, vector<32x32xf32>
    %cst = arith.constant dense<0.000000e+00> : vector<8x32xf32>
    %2 = tpu.matmul %0, %1, %cst {dimension_numbers = #tpu.dot_dimension_numbers<[1], [0], [0], [1], [0, 0, 1, 1], [], []>} : vector<8x32xf32>, vector<32x32xf32>, vector<8x32xf32> -> vector<8x32xf32>
    %c0_3 = arith.constant 0 : index
    %c0_4 = arith.constant 0 : index
    %3 = vector.load %arg2[%c0_3, %c0_4] : memref<1x32xf32, #tpu.memory_space<vmem>>, vector<1x32xf32>
    %4 = vector.broadcast %3 : vector<1x32xf32> to vector<8x32xf32>
    %5 = arith.addf %2, %4 : vector<8x32xf32>
    %cst_5 = arith.constant 0.000000e+00 : f32
    %6 = vector.broadcast %cst_5 : f32 to vector<8x32xf32>
    %7 = arith.maximumf %5, %6 : vector<8x32xf32>
    %c0_6 = arith.constant 0 : index
    %c0_7 = arith.constant 0 : index
    %8 = vector.load %arg3[%c0_6, %c0_7] : memref<32x32xf32, #tpu.memory_space<vmem>>, vector<32x32xf32>
    %cst_8 = arith.constant dense<0.000000e+00> : vector<8x32xf32>
    %9 = tpu.matmul %7, %8, %cst_8 {dimension_numbers = #tpu.dot_dimension_numbers<[1], [0], [0], [1], [0, 0, 1, 1], [], []>} : vector<8x32xf32>, vector<32x32xf32>, vector<8x32xf32> -> vector<8x32xf32>
    %c0_9 = arith.constant 0 : index
    %c0_10 = arith.constant 0 : index
    %10 = vector.load %arg4[%c0_9, %c0_10] : memref<1x32xf32, #tpu.memory_space<vmem>>, vector<1x32xf32>
    %11 = vector.broadcast %10 : vector<1x32xf32> to vector<8x32xf32>
    %12 = arith.addf %9, %11 : vector<8x32xf32>
    %cst_11 = arith.constant 0.000000e+00 : f32
    %13 = vector.broadcast %cst_11 : f32 to vector<8x32xf32>
    %14 = arith.maximumf %12, %13 : vector<8x32xf32>
    %c0_12 = arith.constant 0 : index
    %c0_13 = arith.constant 0 : index
    %15 = vector.load %arg5[%c0_12, %c0_13] : memref<32x4xf32, #tpu.memory_space<vmem>>, vector<32x4xf32>
    %cst_14 = arith.constant dense<0.000000e+00> : vector<8x4xf32>
    %16 = tpu.matmul %14, %15, %cst_14 {dimension_numbers = #tpu.dot_dimension_numbers<[1], [0], [0], [1], [0, 0, 1, 1], [], []>} : vector<8x32xf32>, vector<32x4xf32>, vector<8x4xf32> -> vector<8x4xf32>
    %c0_15 = arith.constant 0 : index
    %c0_16 = arith.constant 0 : index
    %17 = vector.load %arg6[%c0_15, %c0_16] : memref<1x4xf32, #tpu.memory_space<vmem>>, vector<1x4xf32>
    %18 = vector.broadcast %17 : vector<1x4xf32> to vector<8x4xf32>
    %19 = arith.addf %16, %18 : vector<8x4xf32>
    %c0_17 = arith.constant 0 : index
    %c0_18 = arith.constant 0 : index
    %20 = vector.load %arg20[%c0_17, %c0_18] : memref<8x4xf32, #tpu.memory_space<vmem>>, vector<8x4xf32>
    tpu.vector_store %arg20[%c0_17, %c0_18], %19 {strides = array<i32>} : memref<8x4xf32, #tpu.memory_space<vmem>>, vector<8x4xf32>,
    %cst_19 = arith.constant dense<0xFF800000> : vector<8xf32>
    %21 = vector.multi_reduction <maximumf>, %19, %cst_19 [1] : vector<8x4xf32> to vector<8xf32>
    %22 = vector.shape_cast %21 : vector<8xf32> to vector<8x1xf32>
    %23 = vector.broadcast %22 : vector<8x1xf32> to vector<8x4xf32>
    %24 = arith.subf %19, %23 : vector<8x4xf32>
    %25 = math.exp %24 : vector<8x4xf32>
    %cst_20 = arith.constant dense<0.000000e+00> : vector<8xf32>
    %26 = vector.multi_reduction <add>, %25, %cst_20 [1] : vector<8x4xf32> to vector<8xf32>
    %27 = vector.shape_cast %26 : vector<8xf32> to vector<8x1xf32>
    %28 = vector.broadcast %27 : vector<8x1xf32> to vector<8x4xf32>
    %29 = arith.divf %25, %28 : vector<8x4xf32>
    %c0_21 = arith.constant 0 : index
    %c0_22 = arith.constant 0 : index
    %30 = vector.load %arg7[%c0_21, %c0_22] : memref<32x128xf32, #tpu.memory_space<vmem>>, vector<32x128xf32>
    %cst_23 = arith.constant dense<0.000000e+00> : vector<8x128xf32>
    %31 = tpu.matmul %0, %30, %cst_23 {dimension_numbers = #tpu.dot_dimension_numbers<[1], [0], [0], [1], [0, 0, 1, 1], [], []>} : vector<8x32xf32>, vector<32x128xf32>, vector<8x128xf32> -> vector<8x128xf32>
    %c0_24 = arith.constant 0 : index
    %c0_25 = arith.constant 0 : index
    %32 = vector.load %arg8[%c0_24, %c0_25] : memref<1x128xf32, #tpu.memory_space<vmem>>, vector<1x128xf32>
    %33 = vector.broadcast %32 : vector<1x128xf32> to vector<8x128xf32>
    %34 = arith.addf %31, %33 : vector<8x128xf32>
    %cst_26 = arith.constant 0.000000e+00 : f32
    %35 = vector.broadcast %cst_26 : f32 to vector<8x128xf32>
    %36 = arith.maximumf %34, %35 : vector<8x128xf32>
    %c0_27 = arith.constant 0 : index
    %c0_28 = arith.constant 0 : index
    %37 = vector.load %arg9[%c0_27, %c0_28] : memref<128x128xf32, #tpu.memory_space<vmem>>, vector<128x128xf32>
    %cst_29 = arith.constant dense<0.000000e+00> : vector<8x128xf32>
    %38 = tpu.matmul %36, %37, %cst_29 {dimension_numbers = #tpu.dot_dimension_numbers<[1], [0], [0], [1], [0, 0, 1, 1], [], []>} : vector<8x128xf32>, vector<128x128xf32>, vector<8x128xf32> -> vector<8x128xf32>
    %c0_30 = arith.constant 0 : index
    %c0_31 = arith.constant 0 : index
    %39 = vector.load %arg10[%c0_30, %c0_31] : memref<1x128xf32, #tpu.memory_space<vmem>>, vector<1x128xf32>
    %40 = vector.broadcast %39 : vector<1x128xf32> to vector<8x128xf32>
    %41 = arith.addf %38, %40 : vector<8x128xf32>
    %cst_32 = arith.constant 0.000000e+00 : f32
    %42 = vector.broadcast %cst_32 : f32 to vector<8x128xf32>
    %43 = arith.maximumf %41, %42 : vector<8x128xf32>
    %c0_33 = arith.constant 0 : index
    %c0_34 = arith.constant 0 : index
    %44 = vector.load %arg11[%c0_33, %c0_34] : memref<128x64xf32, #tpu.memory_space<vmem>>, vector<128x64xf32>
    %cst_35 = arith.constant dense<0.000000e+00> : vector<8x64xf32>
    %45 = tpu.matmul %43, %44, %cst_35 {dimension_numbers = #tpu.dot_dimension_numbers<[1], [0], [0], [1], [0, 0, 1, 1], [], []>} : vector<8x128xf32>, vector<128x64xf32>, vector<8x64xf32> -> vector<8x64xf32>
    %c0_36 = arith.constant 0 : index
    %c0_37 = arith.constant 0 : index
    %46 = vector.load %arg12[%c0_36, %c0_37] : memref<1x64xf32, #tpu.memory_space<vmem>>, vector<1x64xf32>
    %47 = vector.broadcast %46 : vector<1x64xf32> to vector<8x64xf32>
    %48 = arith.addf %45, %47 : vector<8x64xf32>
    %49 = math.tanh %48 : vector<8x64xf32>
    %c0_38 = arith.constant 0 : index
    %c0_39 = arith.constant 0 : index
    %50 = vector.load %arg13[%c0_38, %c0_39] : memref<64x128xf32, #tpu.memory_space<vmem>>, vector<64x128xf32>
    %cst_40 = arith.constant dense<0.000000e+00> : vector<8x128xf32>
    %51 = tpu.matmul %49, %50, %cst_40 {dimension_numbers = #tpu.dot_dimension_numbers<[1], [0], [0], [1], [0, 0, 1, 1], [], []>} : vector<8x64xf32>, vector<64x128xf32>, vector<8x128xf32> -> vector<8x128xf32>
    %c0_41 = arith.constant 0 : index
    %c0_42 = arith.constant 0 : index
    %52 = vector.load %arg14[%c0_41, %c0_42] : memref<1x128xf32, #tpu.memory_space<vmem>>, vector<1x128xf32>
    %53 = vector.broadcast %52 : vector<1x128xf32> to vector<8x128xf32>
    %54 = arith.addf %51, %53 : vector<8x128xf32>
    %cst_43 = arith.constant 0.000000e+00 : f32
    %55 = vector.broadcast %cst_43 : f32 to vector<8x128xf32>
    %56 = arith.maximumf %54, %55 : vector<8x128xf32>
    %c0_44 = arith.constant 0 : index
    %c0_45 = arith.constant 0 : index
    %57 = vector.load %arg15[%c0_44, %c0_45] : memref<128x128xf32, #tpu.memory_space<vmem>>, vector<128x128xf32>
    %cst_46 = arith.constant dense<0.000000e+00> : vector<8x128xf32>
    %58 = tpu.matmul %56, %57, %cst_46 {dimension_numbers = #tpu.dot_dimension_numbers<[1], [0], [0], [1], [0, 0, 1, 1], [], []>} : vector<8x128xf32>, vector<128x128xf32>, vector<8x128xf32> -> vector<8x128xf32>
    %c0_47 = arith.constant 0 : index
    %c0_48 = arith.constant 0 : index
    %59 = vector.load %arg16[%c0_47, %c0_48] : memref<1x128xf32, #tpu.memory_space<vmem>>, vector<1x128xf32>
    %60 = vector.broadcast %59 : vector<1x128xf32> to vector<8x128xf32>
    %61 = arith.addf %58, %60 : vector<8x128xf32>
    %cst_49 = arith.constant 0.000000e+00 : f32
    %62 = vector.broadcast %cst_49 : f32 to vector<8x128xf32>
    %63 = arith.maximumf %61, %62 : vector<8x128xf32>
    %c0_50 = arith.constant 0 : index
    %c0_51 = arith.constant 0 : index
    %64 = vector.load %arg17[%c0_50, %c0_51] : memref<128x128xf32, #tpu.memory_space<vmem>>, vector<128x128xf32>
    %cst_52 = arith.constant dense<0.000000e+00> : vector<8x128xf32>
    %65 = tpu.matmul %63, %64, %cst_52 {dimension_numbers = #tpu.dot_dimension_numbers<[1], [0], [0], [1], [0, 0, 1, 1], [], []>} : vector<8x128xf32>, vector<128x128xf32>, vector<8x128xf32> -> vector<8x128xf32>
    %c0_53 = arith.constant 0 : index
    %c0_54 = arith.constant 0 : index
    %66 = vector.load %arg18[%c0_53, %c0_54] : memref<1x128xf32, #tpu.memory_space<vmem>>, vector<1x128xf32>
    %67 = vector.broadcast %66 : vector<1x128xf32> to vector<8x128xf32>
    %68 = arith.addf %65, %67 : vector<8x128xf32>
    %c0_55 = arith.constant 0 : index
    %c0_56 = arith.constant 0 : index
    %69 = vector.load %arg21[%c0_55, %c0_56] : memref<8x128xf32, #tpu.memory_space<vmem>>, vector<8x128xf32>
    tpu.vector_store %arg21[%c0_55, %c0_56], %68 {strides = array<i32>} : memref<8x128xf32, #tpu.memory_space<vmem>>, vector<8x128xf32>,
    %70 = vector.extract_strided_slice %29 {offsets = [0, 0], sizes = [8, 1], strides = [1, 1]} : vector<8x4xf32> to vector<8x1xf32>
    %71 = vector.extract_strided_slice %68 {offsets = [0, 0], sizes = [8, 32], strides = [1, 1]} : vector<8x128xf32> to vector<8x32xf32>
    %72 = vector.broadcast %70 : vector<8x1xf32> to vector<8x32xf32>
    %73 = arith.mulf %72, %71 : vector<8x32xf32>
    %74 = vector.extract_strided_slice %29 {offsets = [0, 1], sizes = [8, 1], strides = [1, 1]} : vector<8x4xf32> to vector<8x1xf32>
    %75 = vector.extract_strided_slice %68 {offsets = [0, 32], sizes = [8, 32], strides = [1, 1]} : vector<8x128xf32> to vector<8x32xf32>
    %76 = vector.broadcast %74 : vector<8x1xf32> to vector<8x32xf32>
    %77 = arith.mulf %76, %75 : vector<8x32xf32>
    %78 = arith.addf %73, %77 : vector<8x32xf32>
    %79 = vector.extract_strided_slice %29 {offsets = [0, 2], sizes = [8, 1], strides = [1, 1]} : vector<8x4xf32> to vector<8x1xf32>
    %80 = vector.extract_strided_slice %68 {offsets = [0, 64], sizes = [8, 32], strides = [1, 1]} : vector<8x128xf32> to vector<8x32xf32>
    %81 = vector.broadcast %79 : vector<8x1xf32> to vector<8x32xf32>
    %82 = arith.mulf %81, %80 : vector<8x32xf32>
    %83 = arith.addf %78, %82 : vector<8x32xf32>
    %84 = vector.extract_strided_slice %29 {offsets = [0, 3], sizes = [8, 1], strides = [1, 1]} : vector<8x4xf32> to vector<8x1xf32>
    %85 = vector.extract_strided_slice %68 {offsets = [0, 96], sizes = [8, 32], strides = [1, 1]} : vector<8x128xf32> to vector<8x32xf32>
    %86 = vector.broadcast %84 : vector<8x1xf32> to vector<8x32xf32>
    %87 = arith.mulf %86, %85 : vector<8x32xf32>
    %88 = arith.addf %83, %87 : vector<8x32xf32>
    %c0_57 = arith.constant 0 : index
    %c0_58 = arith.constant 0 : index
    %89 = vector.load %arg19[%c0_57, %c0_58] : memref<8x32xf32, #tpu.memory_space<vmem>>, vector<8x32xf32>
    tpu.vector_store %arg19[%c0_57, %c0_58], %88 {strides = array<i32>} : memref<8x32xf32, #tpu.memory_space<vmem>>, vector<8x32xf32>,
    return
  }
}

</mosaic_0001>

<bundles_post_ra>
// kernel: tpu_custom_call.1
= control target key start
LH: loop header
LB: loop body
LE: loop exit
PB: predicated region body
PF: predicated region fallthrough
CT: control target
= control target key end

     0   :  { %s2290_s0 = inlined_call_operand.hbm [shape: f32[8,32], index: 0, kind: input, shape index: {}]   ;;  %s2291_s1 = inlined_call_operand.hbm [shape: f32[32,32], index: 1, kind: input, shape index: {}]   ;;  %s2292_s2 = inlined_call_operand.vmem [shape: f32[1,32], index: 2, kind: input, shape index: {}]   ;;  %s2293_s3 = inlined_call_operand.hbm [shape: f32[32,32], index: 3, kind: input, shape index: {}]   ;;  %s2294_s4 = inlined_call_operand.vmem [shape: f32[1,32], index: 4, kind: input, shape index: {}]   ;;  %s2295_s5 = inlined_call_operand.vmem [shape: f32[32,4], index: 5, kind: input, shape index: {}]   ;;  %s2296_s6 = inlined_call_operand.hbm [shape: f32[1,4], index: 6, kind: input, shape index: {}]   ;;  %s2297_s7 = inlined_call_operand.hbm [shape: f32[32,128], index: 7, kind: input, shape index: {}]   ;;  %s2298_s8 = inlined_call_operand.hbm [shape: f32[1,128], index: 8, kind: input, shape index: {}]   ;;  %s2299_s9 = inlined_call_operand.vmem [shape: f32[128,128], index: 9, kind: input, shape index: {}]   ;;  %s2300_s10 = inlined_call_operand.vmem [shape: f32[1,128], index: 10, kind: input, shape index: {}]   ;;  %s2301_s11 = inlined_call_operand.vmem [shape: f32[128,64], index: 11, kind: input, shape index: {}]   ;;  %s2302_s12 = inlined_call_operand.vmem [shape: f32[1,64], index: 12, kind: input, shape index: {}]   ;;  %s2303_s13 = inlined_call_operand.hbm [shape: f32[64,128], index: 13, kind: input, shape index: {}]   ;;  %s2304_s14 = inlined_call_operand.vmem [shape: f32[1,128], index: 14, kind: input, shape index: {}]   ;;  %s2305_s15 = inlined_call_operand.vmem [shape: f32[128,128], index: 15, kind: input, shape index: {}]   ;;  %s2306_s16 = inlined_call_operand.vmem [shape: f32[1,128], index: 16, kind: input, shape index: {}]   ;;  %s2307_s17 = inlined_call_operand.hbm [shape: f32[128,128], index: 17, kind: input, shape index: {}]   ;;  %s2308_s18 = inlined_call_operand.vmem [shape: f32[1,128], index: 18, kind: input, shape index: {}]   ;;  %s2309_s19 = inlined_call_operand.hbm [shape: f32[8,32], index: 19, kind: output, shape index: {0}]   ;;  %s2310_s20 = inlined_call_operand.vmem [shape: f32[8,4], index: 20, kind: output, shape index: {1}]   ;;  %s2311_s21 = inlined_call_operand.hbm [shape: f32[8,128], index: 21, kind: output, shape index: {2}]  }
   0x1   :  { %2318 = sst [smem:[#allocation26_spill]] %s2290_s0 }
   0x2   :  { %2319 = sst [smem:[#allocation27_spill]] %s2291_s1 }
   0x3   :  { %2320 = sst [smem:[#allocation28_spill]] %s2292_s2 }
   0x4   :  { %2321 = sst [smem:[#allocation29_spill]] %s2293_s3 }
   0x5   :  { %2322 = sst [smem:[#allocation30_spill]] %s2294_s4 }
   0x6   :  { %2323 = sst [smem:[#allocation31_spill]] %s2295_s5 }
   0x7   :  { %2324 = sst [smem:[#allocation32_spill]] %s2309_s19 }
   0x8   :  { %2325 = sst [smem:[#allocation33_spill]] %s2311_s21 }
   0x9   :  { %27 = vsyncpa [#allocation3], 0 }
   0xa   :  { %28 = vsyncpa [#allocation6], 0 }
   0xb   :  { %29 = vsyncpa [#allocation9], 0 }
   0xc   :  { %30 = vsyncpa [#allocation12], 0 }
   0xd   :  { %31 = vsyncpa [#allocation15], 0 }
   0xe   :  { %32 = vsyncpa [#allocation4], 0 }
   0xf   :  { %33 = vsyncpa [#allocation18], 0  ;;  %s1773_s2 = smov [#allocation5]   ;;  %s2326_s3 = sld [smem:[#allocation27_spill]] }
  0x10   :  { %s49_s25 = sshll.u32 %s1773_s2, 4  ;;  %s50_s25 = int_to_ptr.vmem [resolvable:$true] %s49_s25 }
  0x15   :  { %s1539_s28 = scalar_lea.hbm %s2326_s3, 512 }
  0x16   :  { %p1540_p0 = scmp.ne.s32.totalorder %s2326_s3, %s1539_s28  ;;  %p1543_p1 = scmp.lt.u32.totalorder %s1539_s28, %s2326_s3 }
  0x18   :  { %p1545_p2 = pnand %p1543_p1, %p1540_p0 }
  0x1a   :  { %1548 = shalt.err (!%p1545_p2)
}
  0x1b   :  { %s1549_s5 = scalar_lea.vmem %s50_s25, 512  ;;  %p1554_p4 = scmp.lt.s32.totalorder %s50_s25, %s50_s25 }
  0x1c   :  { %p1550_p3 = scmp.ne.s32.totalorder %s50_s25, %s1549_s5  ;;  %p1555_p5 = scmp.lt.s32.totalorder %s1549_s5, %s1549_s5 }
  0x1e   :  { %p1556_p6 = por %p1555_p5, %p1554_p4 }
  0x20   :  { %p1557_p7 = pnand %p1556_p6, %p1550_p3 }
  0x22   :  { %1560 = shalt.err (!%p1557_p7)
}
  0x23   :  { %s1774_s22 = smov 128   ;;  %s1775_s23 = smov 8  }
  0x24   :  { %55 = dma.hbm_to_vmem [thread:$0]  %s2326_s3, 512, %s50_s25, [#allocation6], %s1774_s22, %s1774_s22, %s1775_s23  }
  0x25   :  { %s1776_s2 = smov [#allocation8]   ;;  %s1777_s27 = smov [#allocation11]  }
  0x26   :  { %s80_s26 = sshll.u32 %s1776_s2, 4  ;;  %s102_s28 = sshll.u32 %s1777_s27, 4  ;;  %s81_s26 = int_to_ptr.vmem [resolvable:$true] %s80_s26  ;;  %s103_s28 = int_to_ptr.vmem [resolvable:$true] %s102_s28 }
  0x27   :  { %s1561_s4 = scalar_lea.hbm %s2296_s6, 16 }
  0x28   :  { %p1562_p8 = scmp.ne.s32.totalorder %s2296_s6, %s1561_s4  ;;  %p1565_p9 = scmp.lt.u32.totalorder %s1561_s4, %s2296_s6 }
  0x2a   :  { %p1567_p10 = pnand %p1565_p9, %p1562_p8 }
  0x2c   :  { %1570 = shalt.err (!%p1567_p10)
}
  0x2d   :  { %s1571_s25 = scalar_lea.vmem %s81_s26, 16  ;;  %s1575_s3 = scalar_lea.vmem %s81_s26, 32 }
  0x2e   :  { %p1572_p11 = scmp.ne.s32.totalorder %s81_s26, %s1571_s25  ;;  %p1576_p12 = scmp.lt.s32.totalorder %s81_s26, %s81_s26 }
  0x2f   :  { %p1577_p13 = scmp.lt.s32.totalorder %s1575_s3, %s1571_s25 }
  0x31   :  { %p1578_p0 = por %p1577_p13, %p1576_p12 }
  0x33   :  { %p1579_p1 = pnand %p1578_p0, %p1572_p11 }
  0x35   :  { %1582 = shalt.err (!%p1579_p1)
}
  0x36   :  { %83 = dma.hbm_to_vmem [thread:$0]  %s2296_s6, 16, %s81_s26, [#allocation9]  }
  0x37   :  { %s1583_s19 = scalar_lea.hbm %s2298_s8, 16 }
  0x38   :  { %p1584_p2 = scmp.ne.s32.totalorder %s2298_s8, %s1583_s19  ;;  %p1587_p3 = scmp.lt.u32.totalorder %s1583_s19, %s2298_s8 }
  0x3a   :  { %p1589_p4 = pnand %p1587_p3, %p1584_p2 }
  0x3c   :  { %1592 = shalt.err (!%p1589_p4)
}
  0x3d   :  { %s1593_s30 = scalar_lea.vmem %s103_s28, 16  ;;  %s1597_s5 = scalar_lea.vmem %s103_s28, 32 }
  0x3e   :  { %p1594_p5 = scmp.ne.s32.totalorder %s103_s28, %s1593_s30  ;;  %p1598_p6 = scmp.lt.s32.totalorder %s103_s28, %s103_s28 }
  0x3f   :  { %p1599_p7 = scmp.lt.s32.totalorder %s1597_s5, %s1593_s30 }
  0x41   :  { %p1600_p8 = por %p1599_p7, %p1598_p6 }
  0x43   :  { %p1601_p9 = pnand %p1600_p8, %p1594_p5 }
  0x45   :  { %1604 = shalt.err (!%p1601_p9)
}
  0x46   :  { %105 = dma.hbm_to_vmem [thread:$0]  %s2298_s8, 16, %s103_s28, [#allocation12]  }
  0x47   :  { %s1778_s25 = smov [#allocation2]   ;;  %s1779_s1 = smov [#allocation7]  }
  0x48   :  { %s40_s3 = sshll.u32 %s1778_s25, 4  ;;  %s63_s24 = sshll.u32 %s1779_s1, 4  ;;  %s41_s3 = int_to_ptr.vmem [resolvable:$true] %s40_s3  ;;  %s64_s24 = int_to_ptr.vmem [resolvable:$true] %s63_s24 }
  0x49   :  { %s2327_s19 = sld [smem:[#allocation26_spill]] }
  0x4f   :  { %s1605_s21 = scalar_lea.hbm %s2327_s19, 128 }
  0x50   :  { %p1606_p10 = scmp.ne.s32.totalorder %s2327_s19, %s1605_s21  ;;  %p1609_p11 = scmp.lt.u32.totalorder %s1605_s21, %s2327_s19 }
  0x52   :  { %p1611_p12 = pnand %p1609_p11, %p1606_p10 }
  0x54   :  { %1614 = shalt.err (!%p1611_p12)
}
  0x55   :  { %s1615_s8 = scalar_lea.vmem %s41_s3, 128  ;;  %p1620_p0 = scmp.lt.s32.totalorder %s41_s3, %s41_s3 }
  0x56   :  { %p1616_p13 = scmp.ne.s32.totalorder %s41_s3, %s1615_s8  ;;  %p1621_p1 = scmp.lt.s32.totalorder %s1615_s8, %s1615_s8 }
  0x58   :  { %p1622_p2 = por %p1621_p1, %p1620_p0 }
  0x5a   :  { %p1623_p3 = pnand %p1622_p2, %p1616_p13 }
  0x5c   :  { %1626 = shalt.err (!%p1623_p3)
}
  0x5d   :  { %43 = dma.hbm_to_vmem [thread:$0]  %s2327_s19, 128, %s41_s3, [#allocation3]  }
  0x5e   :  { %s2328_s25 = sld [smem:[#allocation29_spill]] }
  0x64   :  { %s1627_s1 = scalar_lea.hbm %s2328_s25, 512 }
  0x65   :  { %p1628_p4 = scmp.ne.s32.totalorder %s2328_s25, %s1627_s1  ;;  %p1631_p5 = scmp.lt.u32.totalorder %s1627_s1, %s2328_s25 }
  0x67   :  { %p1633_p6 = pnand %p1631_p5, %p1628_p4 }
  0x69   :  { %1636 = shalt.err (!%p1633_p6)
}
  0x6a   :  { %s1637_s0 = scalar_lea.vmem %s64_s24, 512  ;;  %p1642_p8 = scmp.lt.s32.totalorder %s64_s24, %s64_s24 }
  0x6b   :  { %p1638_p7 = scmp.ne.s32.totalorder %s64_s24, %s1637_s0  ;;  %p1643_p9 = scmp.lt.s32.totalorder %s1637_s0, %s1637_s0 }
  0x6d   :  { %p1644_p10 = por %p1643_p9, %p1642_p8 }
  0x6f   :  { %p1645_p11 = pnand %p1644_p10, %p1638_p7 }
  0x71   :  { %1648 = shalt.err (!%p1645_p11)
}
  0x72   :  { %69 = dma.hbm_to_vmem [thread:$0]  %s2328_s25, 512, %s64_s24, [#allocation6], %s1774_s22, %s1774_s22, %s1775_s23  }
  0x73   :  { %s1780_s4 = smov [#allocation10]   ;;  %s1781_s8 = smov [#allocation13]  }
  0x74   :  { %s89_s30 = sshll.u32 %s1780_s4, 4  ;;  %s119_s28 = sshll.u32 %s1781_s8, 4  ;;  %s90_s30 = int_to_ptr.vmem [resolvable:$true] %s89_s30  ;;  %s120_s28 = int_to_ptr.vmem [resolvable:$true] %s119_s28 }
  0x75   :  { %s1649_s26 = scalar_lea.hbm %s2297_s7, 512 }
  0x76   :  { %p1650_p12 = scmp.ne.s32.totalorder %s2297_s7, %s1649_s26  ;;  %p1653_p13 = scmp.lt.u32.totalorder %s1649_s26, %s2297_s7 }
  0x78   :  { %p1655_p0 = pnand %p1653_p13, %p1650_p12 }
  0x7a   :  { %1658 = shalt.err (!%p1655_p0)
}
  0x7b   :  { %s1659_s24 = scalar_lea.vmem %s90_s30, 512  ;;  %p1664_p2 = scmp.lt.s32.totalorder %s90_s30, %s90_s30 }
  0x7c   :  { %p1660_p1 = scmp.ne.s32.totalorder %s90_s30, %s1659_s24  ;;  %p1665_p3 = scmp.lt.s32.totalorder %s1659_s24, %s1659_s24 }
  0x7e   :  { %p1666_p4 = por %p1665_p3, %p1664_p2 }
  0x80   :  { %p1667_p5 = pnand %p1666_p4, %p1660_p1 }
  0x82   :  { %1670 = shalt.err (!%p1667_p5)
}
  0x83   :  { %95 = dma.hbm_to_vmem [thread:$0]  %s2297_s7, 512, %s90_s30, [#allocation9], %s1774_s22, %s1774_s22, %s1775_s23  }
  0x84   :  { %s1671_s19 = scalar_lea.hbm %s2303_s13, 1024 }
  0x85   :  { %p1672_p6 = scmp.ne.s32.totalorder %s2303_s13, %s1671_s19  ;;  %p1675_p7 = scmp.lt.u32.totalorder %s1671_s19, %s2303_s13 }
  0x87   :  { %p1677_p8 = pnand %p1675_p7, %p1672_p6 }
  0x89   :  { %1680 = shalt.err (!%p1677_p8)
}
  0x8a   :  { %s1681_s26 = scalar_lea.vmem %s120_s28, 1024  ;;  %p1686_p10 = scmp.lt.s32.totalorder %s120_s28, %s120_s28 }
  0x8b   :  { %p1682_p9 = scmp.ne.s32.totalorder %s120_s28, %s1681_s26  ;;  %p1687_p11 = scmp.lt.s32.totalorder %s1681_s26, %s1681_s26 }
  0x8d   :  { %p1688_p12 = por %p1687_p11, %p1686_p10 }
  0x8f   :  { %p1689_p13 = pnand %p1688_p12, %p1682_p9 }
  0x91   :  { %1692 = shalt.err (!%p1689_p13)
}
  0x92   :  { %125 = dma.hbm_to_vmem [thread:$0]  %s2303_s13, 1024, %s120_s28, [#allocation12], %s1774_s22, %s1774_s22, %s1775_s23  }
  0x93   :  { %s1782_s1 = smov [#allocation14]   ;;  %s1693_s24 = scalar_lea.hbm %s2307_s17, 2048 }
  0x94   :  { %s137_s2 = sshll.u32 %s1782_s1, 4  ;;  %p1694_p0 = scmp.ne.s32.totalorder %s2307_s17, %s1693_s24  ;;  %s138_s2 = int_to_ptr.vmem [resolvable:$true] %s137_s2 }
  0x95   :  { %p1697_p1 = scmp.lt.u32.totalorder %s1693_s24, %s2307_s17 }
  0x97   :  { %p1699_p2 = pnand %p1697_p1, %p1694_p0 }
  0x99   :  { %1702 = shalt.err (!%p1699_p2)
}
  0x9a   :  { %s1703_s19 = scalar_lea.vmem %s138_s2, 2048  ;;  %p1708_p4 = scmp.lt.s32.totalorder %s138_s2, %s138_s2 }
  0x9b   :  { %p1704_p3 = scmp.ne.s32.totalorder %s138_s2, %s1703_s19  ;;  %p1709_p5 = scmp.lt.s32.totalorder %s1703_s19, %s1703_s19 }
  0x9d   :  { %p1710_p6 = por %p1709_p5, %p1708_p4 }
  0x9f   :  { %p1711_p7 = pnand %p1710_p6, %p1704_p3 }
  0xa1   :  { %1714 = shalt.err (!%p1711_p7)
}
  0xa2   :  { %143 = dma.hbm_to_vmem [thread:$0]  %s2307_s17, 2048, %s138_s2, [#allocation15], %s1774_s22, %s1774_s22, %s1775_s23  }
  0xa3   :  { %1759 = dma.done.wait [#allocation3], 128  }
  0xa4   :  { %1760 = vsyncadd [#allocation3], 4294967168 }
  0xa5   :  { %1761 = dma.done.wait [#allocation6], 1024  }
  0xa6   :  { %1762 = vsyncadd [#allocation6], 4294966272 }
  0xa7   :  { %1763 = dma.done.wait [#allocation9], 528  }
  0xa8   :  { %1764 = vsyncadd [#allocation9], 4294966768 }
  0xa9   :  { %1765 = dma.done.wait [#allocation12], 1040  }
  0xaa   :  { %1766 = vsyncadd [#allocation12], 4294966256 }
  0xab   :  { %1767 = dma.done.wait [#allocation15], 2048  }
  0xac   :  { %1768 = vsyncadd [#allocation15], 4294965248  ;;  %v1783_v0 = vmov 0.0|0.0   ;;  %vm1784_vm0 = vmmov 0   ;;  %v1785_v1 = vmov 0.0   ;;  %v171_v2 = vld [vmem:[#allocation5] sm:$0xff] }
  0xad   :  { %1375 = vmatprep.subr.bf16.mxu1 %v1783_v0  ;;  %1180 = vmatprep.mubr.msk.f32.mxu1 %vm1784_vm0, %v1785_v1  ;;  %v172_v3 = vld [vmem:[#allocation5 + $0x8] sm:$0xff]  ;;  %v173_v4 = vld [vmem:[#allocation5 + $0x10] sm:$0xff]  ;;  %v174_v6 = vld [vmem:[#allocation5 + $0x18] sm:$0xff]  ;;  %vm182_vm1 = vcmask 261120   ;;  %s2329_s23 = sld [smem:[#allocation31_spill]]  ;;  %s2330_s26 = sld [smem:[#allocation28_spill]] }
  0xae   :  { %1387 = vmatprep.subr.bf16.mxu0 %v1783_v0  ;;  %1202 = vmatprep.mubr.msk.f32.mxu0 %vm1784_vm0, %v1785_v1  ;;  %v1376_v5 = vpack.c.bf16 %v172_v3, %v171_v2  ;;  %v1379_v7 = vpack.c.bf16 %v174_v6, %v173_v4  ;;  %v257_v8 = vld [vmem:[#allocation7] sm:$0xff]  ;;  %v258_v9 = vld [vmem:[#allocation7 + $0x8] sm:$0xff]  ;;  %v170_v10 = vld [vmem:[#allocation2] sm:$0xff]  ;;  %s2331_s24 = sld [smem:[#allocation30_spill]]  ;;  %vm426_vm2 = vcmask 31744   ;;  %vm724_vm3 = vcmask 523264  }
  0xaf   :  { %v1382_v11 = vpack.c.bf16 %v258_v9, %v257_v8  ;;  %v259_v12 = vld [vmem:[#allocation7 + $0x10] sm:$0xff]  ;;  %v260_v13 = vld [vmem:[#allocation7 + $0x18] sm:$0xff]  ;;  %v439_v19 = vld [vmem:[#allocation10] sm:$0xff]  ;;  %s1790_s17 = smov [#allocation17]  }
  0xb0   :  { %1377 = vmatpush3.bf16.msra.mxu1 %v1376_v5  ;;  %v1385_v14 = vpack.c.bf16 %v260_v13, %v259_v12  ;;  %v440_v20 = vld [vmem:[#allocation10 + $0x8] sm:$0xff]  ;;  %v441_v26 = vld [vmem:[#allocation10 + $0x10] sm:$0xff]  ;;  %v442_v27 = vld [vmem:[#allocation10 + $0x18] sm:$0xff]  ;;  %s1042_s22 = sshll.u32 %s1790_s17, 4  ;;  %s1043_s22 = int_to_ptr.vmem [resolvable:$true] %s1042_s22 }
  0xb1   :  { %1378 = vmatprep.subr.bf16.mxu1 %v1783_v0  ;;  %v1394_v24 = vpack.c.bf16 %v440_v20, %v439_v19  ;;  %v1397_v28 = vpack.c.bf16 %v442_v27, %v441_v26  ;;  %v521_v33 = vld [vmem:[%s2299_s9] sm:$0xff]  ;;  %v522_v34 = vld [vmem:[%s2299_s9 + $0x8] sm:$0xff]  ;;  %v523_v40 = vld [vmem:[%s2299_s9 + $0x10] sm:$0xff]  ;;  %p1720_p9 = scmp.lt.s32.totalorder %s1043_s22, %s1043_s22 }
  0xb2   :  { %v1400_v38 = vpack.c.bf16 %v522_v34, %v521_v33  ;;  %v524_v41 = vld [vmem:[%s2299_s9 + $0x18] sm:$0xff]  ;;  %v525_v43 = vld [vmem:[%s2299_s9 + $0x20] sm:$0xff]  ;;  %v526_v44 = vld [vmem:[%s2299_s9 + $0x28] sm:$0xff] }
  0xb3   :  { %v342_v15 = vld [vmem:[%s2329_s23] sm:$0xff]  ;;  %v343_v16 = vld [vmem:[%s2329_s23 + $0x8] sm:$0xff]  ;;  %v344_v29 = vld [vmem:[%s2329_s23 + $0x10] sm:$0xff]  ;;  %v1403_v42 = vpack.c.bf16 %v524_v41, %v523_v40  ;;  %v1406_v47 = vpack.c.bf16 %v526_v44, %v525_v43 }
  0xb4   :  { %1380 = vmatpush3.bf16.msra.mxu1 %v1379_v7  ;;  %v1388_v17 = vpack.c.bf16 %v343_v16, %v342_v15  ;;  %v1061_v18 = vld [vmem:[%s2330_s26] ss:$0 sm:$0xff]  ;;  %v345_v30 = vld [vmem:[%s2329_s23 + $0x18] sm:$0xff]  ;;  %v527_v48 = vld [vmem:[%s2299_s9 + $0x30] sm:$0xff]  ;;  %s1715_s23 = scalar_lea.vmem %s1043_s22, 128 }
  0xb5   :  { %1381 = vmatprep.subr.bf16.mxu1 %v1783_v0  ;;  %v1391_v31 = vpack.c.bf16 %v345_v30, %v344_v29  ;;  %v1063_v32 = vld [vmem:[%s2331_s24] ss:$0 sm:$0xff]  ;;  %v528_v49 = vld [vmem:[%s2299_s9 + $0x38] sm:$0xff]  ;;  %v530_v52 = vld [vmem:[%s2299_s9 + $0x48] sm:$0xff]  ;;  %p1716_p8 = scmp.ne.s32.totalorder %s1043_s22, %s1715_s23  ;;  %p1721_p10 = scmp.lt.s32.totalorder %s1715_s23, %s1715_s23 }
  0xb6   :  { %1389 = vmatpush3.bf16.msra.mxu0 %v1388_v17  ;;  %v1409_v50 = vpack.c.bf16 %v528_v49, %v527_v48  ;;  %v529_v51 = vld [vmem:[%s2299_s9 + $0x40] sm:$0xff]  ;;  %v531_v54 = vld [vmem:[%s2299_s9 + $0x50] sm:$0xff]  ;;  %v532_v55 = vld [vmem:[%s2299_s9 + $0x58] sm:$0xff] }
  0xb7   :  { %1181 = vmatmul.mubr.msk.f32.vlgmr.msra.gmra.mrb[0].mxu1 %vm182_vm1, %v170_v10  ;;  %1390 = vmatprep.subr.bf16.mxu0 %v1783_v0  ;;  %v1412_v53 = vpack.c.bf16 %v530_v52, %v529_v51  ;;  %v1415_v56 = vpack.c.bf16 %v532_v55, %v531_v54  ;;  %v533_v57 = vld [vmem:[%s2299_s9 + $0x60] sm:$0xff]  ;;  %v534_v58 = vld [vmem:[%s2299_s9 + $0x68] sm:$0xff]  ;;  %v535_v61 = vld [vmem:[%s2299_s9 + $0x70] sm:$0xff]  ;;  %v1786_v55 = vmov 3   ;;  %p1722_p11 = por %p1721_p10, %p1720_p9 }
  0xb8   :  { %1383 = vmatpush3.bf16.msra.mxu1 %v1382_v11  ;;  %1191 = vmatprep.mubr.msk.f32.mxu1 %vm1784_vm0, %v1785_v1  ;;  %v1418_v59 = vpack.c.bf16 %v534_v58, %v533_v57  ;;  %v1067_v60 = vld [vmem:[#allocation11] ss:$0 sm:$0xff]  ;;  %v536_v62 = vld [vmem:[%s2299_s9 + $0x78] sm:$0xff]  ;;  %v615_v4 = vld [vmem:[%s2301_s11] sm:$0xff] }
  0xb9   :  { %1384 = vmatprep.subr.bf16.mxu1 %v1783_v0  ;;  %v1421_v2 = vpack.c.bf16 %v536_v62, %v535_v61  ;;  %v616_v5 = vld [vmem:[%s2301_s11 + $0x8] sm:$0xff]  ;;  %v617_v7 = vld [vmem:[%s2301_s11 + $0x10] sm:$0xff]  ;;  %v618_v8 = vld [vmem:[%s2301_s11 + $0x18] sm:$0xff]  ;;  %1531 = vset.pattern.permute.xlu0 %v1786_v55  ;;  %p1723_p12 = pnand %p1722_p11, %p1716_p8 }
  0xba   :  { %1392 = vmatpush3.bf16.msra.mxu0 %v1391_v31  ;;  %v1424_v6 = vpack.c.bf16 %v616_v5, %v615_v4  ;;  %v1427_v9 = vpack.c.bf16 %v618_v8, %v617_v7  ;;  %v620_v11 = vld [vmem:[%s2301_s11 + $0x28] sm:$0xff]  ;;  %v621_v13 = vld [vmem:[%s2301_s11 + $0x30] sm:$0xff]  ;;  %v623_v16 = vld [vmem:[%s2301_s11 + $0x40] sm:$0xff]  ;;  %v1788_v7 = vmov 2  }
  0xbb   :  { %1399 = vmatprep.subr.bf16.mxu0 %v1783_v0  ;;  %v624_v17 = vld [vmem:[%s2301_s11 + $0x48] sm:$0xff]  ;;  %v625_v19 = vld [vmem:[%s2301_s11 + $0x50] sm:$0xff]  ;;  %v626_v20 = vld [vmem:[%s2301_s11 + $0x58] sm:$0xff] }
  0xbc   :  { %1386 = vmatpush3.bf16.msra.mxu1 %v1385_v14  ;;  %v622_v14 = vld [vmem:[%s2301_s11 + $0x38] sm:$0xff]  ;;  %v1069_v33 = vld [vmem:[%s2300_s10] ss:$0 sm:$0xff]  ;;  %v713_v44 = vld [vmem:[#allocation13 + $0x20] sm:$0xff] }
  0xbd   :  { %1393 = vmatprep.subr.bf16.mxu1 %v1783_v0  ;;  %v1433_v15 = vpack.c.bf16 %v622_v14, %v621_v13  ;;  %v630_v26 = vld [vmem:[%s2301_s11 + $0x78] sm:$0xff]  ;;  %v716_v48 = vld [vmem:[#allocation13 + $0x38] sm:$0xff]  ;;  %v1070_v57 = vld [vmem:[%s2302_s12] ss:$0 sm:$0xff] }
  0xbe   :  { %v711_v41 = vld [vmem:[#allocation13 + $0x10] sm:$0xff]  ;;  %v800_v4 = vld [vmem:[%s2305_s15 + $0x8] sm:$0xff]  ;;  %v805_v13 = vld [vmem:[%s2305_s15 + $0x30] sm:$0xff] }
  0xbf   :  { %v806_v14 = vld [vmem:[%s2305_s15 + $0x38] sm:$0xff]  ;;  %v908_v55 = vld [vmem:[#allocation14 + $0x78] sm:$0xff] }
 0x18a   :  { %v252_v21 = vpop.f32.mrb[0].mxu1 }
 0x18b   :  { %v253_v22 = vadd.f32 %v1061_v18, %v252_v21  ;;  %v1182_v23 = vpop.f32.mrb[1].mxu1  ;;  %v1436_v18 = vpack.c.bf16 %v624_v17, %v623_v16  ;;  %v1439_v21 = vpack.c.bf16 %v626_v20, %v625_v19  ;;  %v807_v16 = vld [vmem:[%s2305_s15 + $0x40] sm:$0xff]  ;;  %v808_v17 = vld [vmem:[%s2305_s15 + $0x48] sm:$0xff]  ;;  %v809_v19 = vld [vmem:[%s2305_s15 + $0x50] sm:$0xff] }
 0x18c   :  { %v628_v23 = vld [vmem:[%s2301_s11 + $0x68] sm:$0xff]  ;;  %v810_v20 = vld [vmem:[%s2305_s15 + $0x58] sm:$0xff] }
 0x18d   :  { %v256_v25 = vmax.f32 %v253_v22, 0.0  ;;  %v627_v22 = vld [vmem:[%s2301_s11 + $0x60] sm:$0xff] }
 0x18f   :  { %1192 = vmatmul.mubr.msk.f32.vlgmr.msra.gmra.mrb[2].mxu1 %vm182_vm1, %v256_v25  ;;  %v629_v25 = vld [vmem:[%s2301_s11 + $0x70] sm:$0xff] }
 0x190   :  { %1395 = vmatpush3.bf16.msra.mxu1 %v1394_v24  ;;  %1213 = vmatprep.mubr.msk.f32.mxu1 %vm1784_vm0, %v1785_v1  ;;  %v1442_v24 = vpack.c.bf16 %v628_v23, %v627_v22  ;;  %v1445_v27 = vpack.c.bf16 %v630_v26, %v629_v25  ;;  %v811_v22 = vld [vmem:[%s2305_s15 + $0x60] sm:$0xff]  ;;  %v812_v23 = vld [vmem:[%s2305_s15 + $0x68] sm:$0xff]  ;;  %v813_v25 = vld [vmem:[%s2305_s15 + $0x70] sm:$0xff] }
 0x191   :  { %1396 = vmatprep.subr.bf16.mxu1 %v1783_v0  ;;  %v814_v26 = vld [vmem:[%s2305_s15 + $0x78] sm:$0xff] }
 0x194   :  { %1398 = vmatpush3.bf16.msra.mxu1 %v1397_v28  ;;  %v1065_v28 = vld [vmem:[#allocation8] ss:$0 sm:$0xff] }
 0x195   :  { %1423 = vmatprep.subr.bf16.mxu1 %v1783_v0 }
 0x197   :  { %1214 = vmatmul.mubr.msk.f32.vlgmr.msra.gmra.mrb[4].mxu1 %vm182_vm1, %v170_v10  ;;  %v619_v10 = vld [vmem:[%s2301_s11 + $0x20] sm:$0xff] }
 0x198   :  { %1283 = vmatprep.mubr.msk.f32.mxu1 %vm1784_vm0, %v1785_v1  ;;  %1425 = vmatpush3.bf16.msra.mxu1 %v1424_v6  ;;  %v1430_v12 = vpack.c.bf16 %v620_v11, %v619_v10  ;;  %v802_v6 = vld [vmem:[%s2305_s15 + $0x18] sm:$0xff]  ;;  %v804_v10 = vld [vmem:[%s2305_s15 + $0x28] sm:$0xff] }
 0x199   :  { %1426 = vmatprep.subr.bf16.mxu1 %v1783_v0 }
 0x19c   :  { %1428 = vmatpush3.bf16.msra.mxu1 %v1427_v9  ;;  %v803_v9 = vld [vmem:[%s2305_s15 + $0x20] sm:$0xff] }
 0x19d   :  { %1429 = vmatprep.subr.bf16.mxu1 %v1783_v0  ;;  %v1466_v11 = vpack.c.bf16 %v804_v10, %v803_v9 }
 0x1a0   :  { %1431 = vmatpush3.bf16.msra.mxu1 %v1430_v12  ;;  %v1789_v12 = vmov 0  }
 0x1a1   :  { %1432 = vmatprep.subr.bf16.mxu1 %v1783_v0 }
 0x1a4   :  { %1434 = vmatpush3.bf16.msra.mxu1 %v1433_v15  ;;  %v1469_v15 = vpack.c.bf16 %v806_v14, %v805_v13 }
 0x1a5   :  { %1435 = vmatprep.subr.bf16.mxu1 %v1783_v0 }
 0x1a8   :  { %1437 = vmatpush3.bf16.msra.mxu1 %v1436_v18  ;;  %v1472_v18 = vpack.c.bf16 %v808_v17, %v807_v16 }
 0x1a9   :  { %1438 = vmatprep.subr.bf16.mxu1 %v1783_v0 }
 0x1ac   :  { %1440 = vmatpush3.bf16.msra.mxu1 %v1439_v21  ;;  %v1475_v21 = vpack.c.bf16 %v810_v20, %v809_v19 }
 0x1ad   :  { %1441 = vmatprep.subr.bf16.mxu1 %v1783_v0 }
 0x1b0   :  { %1443 = vmatpush3.bf16.msra.mxu1 %v1442_v24  ;;  %v1478_v24 = vpack.c.bf16 %v812_v23, %v811_v22 }
 0x1b1   :  { %1444 = vmatprep.subr.bf16.mxu1 %v1783_v0 }
 0x1b4   :  { %1446 = vmatpush3.bf16.msra.mxu1 %v1445_v27  ;;  %v1481_v27 = vpack.c.bf16 %v814_v26, %v813_v25 }
 0x1b5   :  { %1459 = vmatprep.subr.bf16.mxu1 %v1783_v0 }
 0x262   :  { %v337_v35 = vpop.f32.mrb[2].mxu1 }
 0x263   :  { %v338_v36 = vadd.f32 %v1063_v32, %v337_v35  ;;  %v1193_v37 = vpop.f32.mrb[3].mxu1 }
 0x264   :  { %v709_v37 = vld [vmem:[#allocation13] sm:$0xff] }
 0x265   :  { %v341_v39 = vmax.f32 %v338_v36, 0.0 }
 0x267   :  { %1203 = vmatmul.mubr.msk.f32.vlgmr.msra.gmra.mrb[0].mxu0 %vm182_vm1, %v341_v39 }
 0x268   :  { %1401 = vmatpush3.bf16.msra.mxu0 %v1400_v38  ;;  %1248 = vmatprep.mubr.msk.f32.mxu0 %vm1784_vm0, %v1785_v1  ;;  %v710_v38 = vld [vmem:[#allocation13 + $0x8] sm:$0xff] }
 0x269   :  { %1402 = vmatprep.subr.bf16.mxu0 %v1783_v0  ;;  %v1448_v40 = vpack.c.bf16 %v710_v38, %v709_v37  ;;  %v899_v37 = vld [vmem:[#allocation14 + $0x30] sm:$0xff]  ;;  %v900_v38 = vld [vmem:[#allocation14 + $0x38] sm:$0xff] }
 0x26a   :  { %v516_v45 = vpop.f32.mrb[4].mxu1 }
 0x26b   :  { %v1215_v46 = vpop.f32.mrb[5].mxu1  ;;  %v517_v63 = vadd.f32 %v1067_v60, %v516_v45  ;;  %v714_v45 = vld [vmem:[#allocation13 + $0x28] sm:$0xff] }
 0x26c   :  { %1404 = vmatpush3.bf16.msra.mxu0 %v1403_v42  ;;  %v712_v42 = vld [vmem:[#allocation13 + $0x18] sm:$0xff]  ;;  %v1454_v46 = vpack.c.bf16 %v714_v45, %v713_v44 }
 0x26d   :  { %1405 = vmatprep.subr.bf16.mxu0 %v1783_v0  ;;  %v520_v3 = vmax.f32 %v517_v63, 0.0  ;;  %v1451_v43 = vpack.c.bf16 %v712_v42, %v711_v41  ;;  %v902_v41 = vld [vmem:[#allocation14 + $0x48] sm:$0xff]  ;;  %v904_v44 = vld [vmem:[#allocation14 + $0x58] sm:$0xff] }
 0x270   :  { %1407 = vmatpush3.bf16.msra.mxu0 %v1406_v47  ;;  %v715_v47 = vld [vmem:[#allocation13 + $0x30] sm:$0xff] }
 0x271   :  { %1408 = vmatprep.subr.bf16.mxu0 %v1783_v0  ;;  %v1457_v49 = vpack.c.bf16 %v716_v48, %v715_v47  ;;  %v906_v47 = vld [vmem:[#allocation14 + $0x68] sm:$0xff] }
 0x274   :  { %1410 = vmatpush3.bf16.msra.mxu0 %v1409_v50 }
 0x275   :  { %1411 = vmatprep.subr.bf16.mxu0 %v1783_v0 }
 0x278   :  { %1413 = vmatpush3.bf16.msra.mxu0 %v1412_v53 }
 0x279   :  { %1414 = vmatprep.subr.bf16.mxu0 %v1783_v0 }
 0x27c   :  { %1416 = vmatpush3.bf16.msra.mxu0 %v1415_v56  ;;  %v1787_v56 = vmov 1  }
 0x27d   :  { %1417 = vmatprep.subr.bf16.mxu0 %v1783_v0  ;;  %1529 = vset.pattern.permute.xlu1 %v1787_v56 }
 0x280   :  { %1419 = vmatpush3.bf16.msra.mxu0 %v1418_v59 }
 0x281   :  { %1420 = vmatprep.subr.bf16.mxu0 %v1783_v0 }
 0x284   :  { %1422 = vmatpush3.bf16.msra.mxu0 %v1421_v2 }
 0x285   :  { %1447 = vmatprep.subr.bf16.mxu0 %v1783_v0 }
 0x287   :  { %1249 = vmatmul.mubr.f32.vlgmr.msra.gmra.mrb[2].mxu0 %v520_v3  ;;  %v799_v3 = vld [vmem:[%s2305_s15] sm:$0xff] }
 0x288   :  { %1302 = vmatprep.mubr.msk.f32.mxu0 %vm1784_vm0, %v1785_v1  ;;  %1449 = vmatpush3.bf16.msra.mxu0 %v1448_v40  ;;  %v1460_v5 = vpack.c.bf16 %v800_v4, %v799_v3  ;;  %v901_v40 = vld [vmem:[#allocation14 + $0x40] sm:$0xff] }
 0x289   :  { %1450 = vmatprep.subr.bf16.mxu0 %v1783_v0  ;;  %v1496_v42 = vpack.c.bf16 %v902_v41, %v901_v40 }
 0x28c   :  { %1452 = vmatpush3.bf16.msra.mxu0 %v1451_v43  ;;  %v903_v43 = vld [vmem:[#allocation14 + $0x50] sm:$0xff] }
 0x28d   :  { %1453 = vmatprep.subr.bf16.mxu0 %v1783_v0  ;;  %v1499_v45 = vpack.c.bf16 %v904_v44, %v903_v43 }
 0x290   :  { %1455 = vmatpush3.bf16.msra.mxu0 %v1454_v46  ;;  %v905_v46 = vld [vmem:[#allocation14 + $0x60] sm:$0xff] }
 0x291   :  { %1456 = vmatprep.subr.bf16.mxu0 %v1783_v0  ;;  %v1502_v48 = vpack.c.bf16 %v906_v47, %v905_v46 }
 0x294   :  { %1458 = vmatpush3.bf16.msra.mxu0 %v1457_v49  ;;  %v1071_v49 = vld [vmem:[%s2304_s14] ss:$0 sm:$0xff] }
 0x295   :  { %1483 = vmatprep.subr.bf16.mxu0 %v1783_v0 }
 0x33a   :  { %v422_v29 = vpop.f32.mrb[0].mxu0 }
 0x33b   :  { %v423_v30 = vadd.f32 %v1065_v28, %v422_v29  ;;  %v1204_v31 = vpop.f32.mrb[1].mxu0  ;;  %v893_v28 = vld [vmem:[#allocation14] sm:$0xff]  ;;  %v894_v29 = vld [vmem:[#allocation14 + $0x8] sm:$0xff] }
 0x33c   :  { %v1484_v31 = vpack.c.bf16 %v894_v29, %v893_v28 }
 0x33d   :  { %v428_v32 = vsel %vm426_vm2, %v423_v30, -inf  ;;  %427 = vst.msk [vmem:[%s2310_s20] sm:$0xff] %vm426_vm2, %v423_v30 }
 0x33e   :  { %429 = vmax.xlane.f32.xlu0 %v428_v32  ;;  %v896_v32 = vld [vmem:[#allocation14 + $0x18] sm:$0xff] }
 0x35a   :  { %v610_v34 = vpop.f32.mrb[2].mxu0 }
 0x35b   :  { %v611_v35 = vadd.f32 %v1069_v33, %v610_v34  ;;  %v1250_v36 = vpop.f32.mrb[3].mxu0  ;;  %v897_v34 = vld [vmem:[#allocation14 + $0x20] sm:$0xff] }
 0x35d   :  { %v614_v39 = vmax.f32 %v611_v35, 0.0  ;;  %v898_v35 = vld [vmem:[#allocation14 + $0x28] sm:$0xff] }
 0x35e   :  { %v1490_v36 = vpack.c.bf16 %v898_v35, %v897_v34 }
 0x35f   :  { %1284 = vmatmul.mubr.f32.vlgmr.msra.gmra.mrb[6].mxu1 %v614_v39  ;;  %v1493_v39 = vpack.c.bf16 %v900_v38, %v899_v37 }
 0x360   :  { %1337 = vmatprep.mubr.msk.f32.mxu1 %vm1784_vm0, %v1785_v1  ;;  %1461 = vmatpush3.bf16.msra.mxu1 %v1460_v5 }
 0x361   :  { %1462 = vmatprep.subr.bf16.mxu1 %v1783_v0 }
 0x3cb   :  { %v430_v50 = vpop.xlane.xlu0 %429 }
 0x3cc   :  { %v431_v51 = vsub.f32 %v423_v30, %v430_v50  ;;  %v895_v30 = vld [vmem:[#allocation14 + $0x10] sm:$0xff] }
 0x3cd   :  { %v1487_v33 = vpack.c.bf16 %v896_v32, %v895_v30 }
 0x3ce   :  { %v432_v52 = vmul.f32 1.442695, %v431_v51 }
 0x3d0   :  { %1533 = vpow2.f32 %v432_v52 }
 0x3da   :  { %v1534_v53 = vpop.eup %1533 }
 0x3db   :  { %v434_v54 = vsel %vm426_vm2, %v1534_v53, 0.0 }
 0x3dc   :  { %435 = vadd.xlane.f32.xlu0 %v434_v54  ;;  %v907_v54 = vld [vmem:[#allocation14 + $0x70] sm:$0xff] }
 0x3dd   :  { %v1505_v56 = vpack.c.bf16 %v908_v55, %v907_v54 }
 0x432   :  { %v704_v58 = vpop.f32.mrb[6].mxu1 }
 0x433   :  { %v705_v59 = vadd.f32 %v1070_v57, %v704_v58  ;;  %v1285_v60 = vpop.f32.mrb[7].mxu1  ;;  %v1073_v57 = vld [vmem:[%s2306_s16] ss:$0 sm:$0xff] }
 0x435   :  { %1535 = vtanh.f32 %v705_v59 }
 0x43f   :  { %v1536_v61 = vpop.eup %1535 }
 0x440   :  { %1303 = vmatmul.mubr.msk.f32.vlgmr.msra.gmra.mrb[4].mxu0 %vm724_vm3, %v1536_v61  ;;  %v1074_v61 = vld [vmem:[%s2308_s18] ss:$0 sm:$0xff] }
 0x441   :  { %1372 = vmatprep.mubr.msk.f32.mxu0 %vm1784_vm0, %v1785_v1  ;;  %v801_v1 = vld [vmem:[%s2305_s15 + $0x10] sm:$0xff]  ;;  %1485 = vmatpush3.bf16.msra.mxu0 %v1484_v31 }
 0x442   :  { %v1463_v8 = vpack.c.bf16 %v802_v6, %v801_v1  ;;  %1486 = vmatprep.subr.bf16.mxu0 %v1783_v0 }
 0x444   :  { %1464 = vmatpush3.bf16.msra.mxu1 %v1463_v8 }
 0x445   :  { %1465 = vmatprep.subr.bf16.mxu1 %v1783_v0  ;;  %1488 = vmatpush3.bf16.msra.mxu0 %v1487_v33 }
 0x446   :  { %1489 = vmatprep.subr.bf16.mxu0 %v1783_v0 }
 0x448   :  { %1467 = vmatpush3.bf16.msra.mxu1 %v1466_v11 }
 0x449   :  { %1468 = vmatprep.subr.bf16.mxu1 %v1783_v0  ;;  %1491 = vmatpush3.bf16.msra.mxu0 %v1490_v36 }
 0x44a   :  { %1492 = vmatprep.subr.bf16.mxu0 %v1783_v0 }
 0x44c   :  { %1470 = vmatpush3.bf16.msra.mxu1 %v1469_v15 }
 0x44d   :  { %1471 = vmatprep.subr.bf16.mxu1 %v1783_v0  ;;  %1494 = vmatpush3.bf16.msra.mxu0 %v1493_v39 }
 0x44e   :  { %1495 = vmatprep.subr.bf16.mxu0 %v1783_v0 }
 0x450   :  { %1473 = vmatpush3.bf16.msra.mxu1 %v1472_v18 }
 0x451   :  { %1474 = vmatprep.subr.bf16.mxu1 %v1783_v0  ;;  %1497 = vmatpush3.bf16.msra.mxu0 %v1496_v42 }
 0x452   :  { %1498 = vmatprep.subr.bf16.mxu0 %v1783_v0 }
 0x454   :  { %1476 = vmatpush3.bf16.msra.mxu1 %v1475_v21 }
 0x455   :  { %1477 = vmatprep.subr.bf16.mxu1 %v1783_v0  ;;  %1500 = vmatpush3.bf16.msra.mxu0 %v1499_v45 }
 0x456   :  { %1501 = vmatprep.subr.bf16.mxu0 %v1783_v0 }
 0x458   :  { %1479 = vmatpush3.bf16.msra.mxu1 %v1478_v24 }
 0x459   :  { %1480 = vmatprep.subr.bf16.mxu1 %v1783_v0  ;;  %1503 = vmatpush3.bf16.msra.mxu0 %v1502_v48 }
 0x45a   :  { %1504 = vmatprep.subr.bf16.mxu0 %v1783_v0 }
 0x45c   :  { %1482 = vmatpush3.bf16.msra.mxu1 %v1481_v27 }
 0x45d   :  { %1506 = vmatpush3.bf16.msra.mxu0 %v1505_v56 }
 0x469   :  { %v436_v62 = vpop.xlane.xlu0 %435 }
 0x46a   :  { %1537 = vrcp.f32 %v436_v62 }
 0x474   :  { %v1538_v63 = vpop.eup %1537 }
 0x475   :  { %v438_v2 = vmul.f32 %v1538_v63, %v1534_v53 }
 0x477   :  { %1014 = vperm.xlu0 %1531, %v438_v2   ;;  %994 = vperm.xlu1 %1529, %v438_v2  }
 0x47b   :  { %1530 = vset.pattern.permute.xlu1 %v1788_v7 }
 0x47c   :  { %1004 = vperm.xlu1 %1530, %v438_v2  }
 0x480   :  { %1532 = vset.pattern.permute.xlu1 %v1789_v12 }
 0x481   :  { %989 = vperm.xlu1 %1532, %v438_v2  }
 0x4f6   :  { %v995_v62 = vpop.permute.xlu1 %994 }
 0x513   :  { %v794_v50 = vpop.f32.mrb[4].mxu0 }
 0x514   :  { %v795_v51 = vadd.f32 %v1071_v49, %v794_v50  ;;  %v1304_v52 = vpop.f32.mrb[5].mxu0 }
 0x516   :  { %v798_v53 = vmax.f32 %v795_v51, 0.0 }
 0x518   :  { %1338 = vmatmul.mubr.f32.vlgmr.msra.gmra.mrb[8].mxu1 %v798_v53 }
 0x5eb   :  { %v888_v58 = vpop.f32.mrb[8].mxu1 }
 0x5ec   :  { %v889_v59 = vadd.f32 %v1073_v57, %v888_v58  ;;  %v1339_v0 = vpop.f32.mrb[9].mxu1 }
 0x5ee   :  { %v892_v60 = vmax.f32 %v889_v59, 0.0 }
 0x5f0   :  { %1373 = vmatmul.mubr.f32.vlgmr.msra.gmra.mrb[6].mxu0 %v892_v60 }
 0x6c3   :  { %v982_v63 = vpop.f32.mrb[6].mxu0 }
 0x6c4   :  { %v983_v2 = vadd.f32 %v1074_v61, %v982_v63  ;;  %v1374_v3 = vpop.f32.mrb[7].mxu0 }
 0x6c6   :  { %986 = vst [vmem:[#allocation17] sm:$0xff] %v983_v2  ;;  %v997_v4 = vmul.f32 %v995_v62, %v983_v2 }
 0x6c7   :  { %1726 = shalt.err (!%p1723_p12)
}
 0x6c8   :  { %s2332_s8 = sld [smem:[#allocation33_spill]] }
 0x6ce   :  { %s1727_s18 = scalar_lea.hbm %s2332_s8, 128 }
 0x6cf   :  { %p1728_p13 = scmp.ne.s32.totalorder %s2332_s8, %s1727_s18  ;;  %p1731_p0 = scmp.lt.u32.totalorder %s1727_s18, %s2332_s8 }
 0x6d1   :  { %p1733_p1 = pnand %p1731_p0, %p1728_p13 }
 0x6d3   :  { %1736 = shalt.err (!%p1733_p1)
}
 0x6d4   :  { %1045 = dma.vmem_to_hbm [thread:$0]  %s1043_s22, 128, %s2332_s8, [#allocation18]   ;;  %v1005_v5 = vpop.permute.xlu1 %1004  ;;  %v1015_v6 = vpop.permute.xlu0 %1014 }
 0x6d5   :  { %s1791_s1 = smov 96   ;;  %v1007_v1 = vmul.f32 %v1005_v5, %v983_v2  ;;  %s1792_s2 = smov 64   ;;  %v1017_v7 = vmul.f32 %v1015_v6, %v983_v2 }
 0x6d6   :  { %999 = vrot.lane.b32.xlu1 %v997_v4, %s1791_s1  ;;  %s1793_s27 = smov 32   ;;  %s1794_s21 = smov [#allocation16]  }
 0x6d7   :  { %s1030_s24 = sshll.u32 %s1794_s21, 4  ;;  %s1031_s24 = int_to_ptr.vmem [resolvable:$true] %s1030_s24 }
 0x6d8   :  { %v990_v8 = vpop.permute.xlu1 %989  ;;  %s1737_s10 = scalar_lea.vmem %s1031_s24, 128  ;;  %p1742_p3 = scmp.lt.s32.totalorder %s1031_s24, %s1031_s24 }
 0x6d9   :  { %v992_v10 = vmul.f32 %v990_v8, %v983_v2  ;;  %p1738_p2 = scmp.ne.s32.totalorder %s1031_s24, %s1737_s10  ;;  %p1743_p4 = scmp.lt.s32.totalorder %s1737_s10, %s1737_s10 }
 0x6da   :  { %1009 = vrot.lane.b32.xlu1 %v1007_v1, %s1792_s2 }
 0x6db   :  { %p1744_p5 = por %p1743_p4, %p1742_p3 }
 0x6dd   :  { %p1745_p6 = pnand %p1744_p5, %p1738_p2 }
 0x6de   :  { %1019 = vrot.lane.b32.xlu1 %v1017_v7, %s1793_s27 }
 0x748   :  { %v1000_v9 = vpop.permute.xlu1 %999 }
 0x749   :  { %v1002_v12 = vadd.f32 %v1000_v9, %v992_v10 }
 0x74c   :  { %v1010_v11 = vpop.permute.xlu1 %1009 }
 0x74d   :  { %v1012_v13 = vadd.f32 %v1010_v11, %v1002_v12 }
 0x750   :  { %v1020_v14 = vpop.permute.xlu1 %1019 }
 0x751   :  { %v1022_v15 = vadd.f32 %v1020_v14, %v1012_v13 }
 0x753   :  { %1023 = vst.msk [vmem:[#allocation16] sm:$0xff] %vm182_vm1, %v1022_v15 }
 0x754   :  { %1748 = shalt.err (!%p1745_p6)
}
 0x755   :  { %s2333_s25 = sld [smem:[#allocation32_spill]] }
 0x75b   :  { %s1749_s29 = scalar_lea.hbm %s2333_s25, 128 }
 0x75c   :  { %p1750_p7 = scmp.ne.s32.totalorder %s2333_s25, %s1749_s29  ;;  %p1753_p8 = scmp.lt.u32.totalorder %s1749_s29, %s2333_s25 }
 0x75e   :  { %p1755_p9 = pnand %p1753_p8, %p1750_p7 }
 0x760   :  { %1758 = shalt.err (!%p1755_p9)
}
 0x761   :  { %1033 = dma.vmem_to_hbm [thread:$0]  %s1031_s24, 128, %s2333_s25, [#allocation4]  }
 0x762   :  { %1769 = dma.done.wait [#allocation4], 128  }
 0x763   :  { %1770 = vsyncadd [#allocation4], 4294967168 }
 0x764   :  { %1771 = dma.done.wait [#allocation18], 128  }
 0x765   :  { %1772 = vsyncadd [#allocation18], 4294967168 }
 0x766   :  { %1054 = vsyncpa [#allocation3], 1 }
 0x767   :  { %1055 = vsyncpa [#allocation6], 1 }
 0x768   :  { %1056 = vsyncpa [#allocation9], 1 }
 0x769   :  { %1057 = vsyncpa [#allocation12], 1 }
 0x76a   :  { %1058 = vsyncpa [#allocation15], 1 }
 0x76b   :  { %1059 = vsyncpa [#allocation4], 1 }
 0x76c   :  { %1060 = vsyncpa [#allocation18], 1 }

</bundles_post_ra>
